<compile_context>
chip_gen: v5e
topology: v5e:2x2
jax: 0.10.0
libtpu: 0.0.40
codegen_flags: <defaults>
</compile_context>

<pallas_src>
import jax
import jax.numpy as jnp
from jax import lax
from jax.experimental import pallas as pl
from jax.experimental.pallas import tpu as pltpu


# ----------------------------- config ---------------------------------------
N_VOCAB = 50
EMBED = 32
FILTER_SIZES = (3, 5)
NUM_FILTERS = 16
NUM_CLASSES = 4
SEQ_LEN = 8
BATCH = 2
NB = len(FILTER_SIZES)
INN_FEA = NUM_FILTERS * NB               # 32
HID = INN_FEA // 2                       # 16
KMAX = max(FILTER_SIZES)                 # 5

LANES = 128
V_PAD = ((N_VOCAB + 7) // 8) * 8         # 56 (8-aligned vocab rows)
C1 = NB * EMBED                          # 64  fused conv1 output width
C2 = NB * NUM_FILTERS                    # 32  fused conv2 output width

# ---- packed-slab row offsets (all 8-sublane aligned) ------------------------
R_EMB = 0                                # (V_PAD, EMBED)
R_W1 = R_EMB + V_PAD                     # 56  : KMAX taps of (EMBED, C1)
R_B1 = R_W1 + KMAX * EMBED               # 216 : (1, C1)
R_W2 = R_B1 + 8                          # 224 : KMAX taps of (C1, C2)
R_B2 = R_W2 + KMAX * C1                  # 544 : (1, C2)
R_L1W = R_B2 + 8                         # 552 : (INN_FEA, HID)
R_L1B = R_L1W + INN_FEA                  # 584 : (1, HID)
R_L2W = R_L1B + 8                        # 592 : (HID, NUM_CLASSES)
R_L2B = R_L2W + HID                      # 608 : (1, NUM_CLASSES)
R_TOT = R_L2B + 8                        # 616 rows total


# --------------------- host-side one-time parameter packing ------------------
def pack_params(params):
    """Pack every weight/bias into one lane-dense f32 slab (done once)."""
    slab = jnp.zeros((R_TOT, LANES), jnp.float32)
    slab = slab.at[R_EMB:R_EMB + N_VOCAB, 0:EMBED].set(params['emb'])
    for j in range(KMAX):                      # tap index on the k=5 grid
        off = j - KMAX // 2                    # sequence offset in [-2, 2]
        for bi, k in enumerate(FILTER_SIZES):
            p = k // 2
            dk = off + p                       # tap index for this branch
            if 0 <= dk < k:
                # conv1 fused tap: rows = input channels, cols split by branch
                r = R_W1 + j * EMBED
                slab = slab.at[r:r + EMBED,
                               bi * EMBED:(bi + 1) * EMBED].set(
                                   params['conv1_w'][bi][dk])
                # conv2 fused tap: block-diagonal over branches
                r = R_W2 + j * C1 + bi * EMBED
                slab = slab.at[r:r + EMBED,
                               bi * NUM_FILTERS:(bi + 1) * NUM_FILTERS].set(
                                   params['conv2_w'][bi][dk])
    for bi in range(NB):
        slab = slab.at[R_B1, bi * EMBED:(bi + 1) * EMBED].set(
            params['conv1_b'][bi])
        slab = slab.at[R_B2, bi * NUM_FILTERS:(bi + 1) * NUM_FILTERS].set(
            params['conv2_b'][bi])
    slab = slab.at[R_L1W:R_L1W + INN_FEA, 0:HID].set(params['lin1_w'])
    slab = slab.at[R_L1B, 0:HID].set(params['lin1_b'])
    slab = slab.at[R_L2W:R_L2W + HID, 0:NUM_CLASSES].set(params['lin2_w'])
    slab = slab.at[R_L2B, 0:NUM_CLASSES].set(params['lin2_b'])
    return slab


# --------------------------- fused Pallas kernel -----------------------------
def _make_fused_kernel(B, L):
    M = B * L

    def kernel(tok_ref, slab_ref, out_ref):
        f32 = jnp.float32

        # ---- embedding lookup: one-hot @ emb (stays in vregs / MXU) --------
        tok = tok_ref[...]                                        # (M, 1) i32
        vio = lax.broadcasted_iota(jnp.int32, (M, V_PAD), 1)
        one_hot = (tok == vio).astype(f32)                        # (M, V_PAD)
        emb = slab_ref[R_EMB:R_EMB + V_PAD, 0:EMBED]              # (V_PAD, E)
        x = jnp.dot(one_hot, emb, preferred_element_type=f32)     # (M, E)

        # ---- constant shift + boundary-mask selection matrices (M x M) -----
        # S_off[t, s] = 1  iff  s == t + off and the shifted position stays
        # inside the same sequence (zero-padding semantics); built once and
        # reused by both conv layers.
        row = lax.broadcasted_iota(jnp.int32, (M, M), 0)
        col = lax.broadcasted_iota(jnp.int32, (M, M), 1)
        pos = row % L
        shift = {}
        for j in range(KMAX):
            off = j - KMAX // 2
            if off == 0:
                continue
            valid = (pos + off >= 0) & (pos + off < L)
            shift[off] = ((col == row + off) & valid).astype(f32)

        def conv(inp, w_row0, k_in, n_out, b_row):
            # Fused-branch conv as KMAX accumulated tap matmuls.
            acc = None
            for j in range(KMAX):
                off = j - KMAX // 2
                src = inp if off == 0 else jnp.dot(
                    shift[off], inp, preferred_element_type=f32)
                w = slab_ref[w_row0 + j * k_in:
                             w_row0 + (j + 1) * k_in, 0:n_out]
                term = jnp.dot(src, w, preferred_element_type=f32)
                acc = term if acc is None else acc + term
            bias = slab_ref[b_row:b_row + 1, 0:n_out]
            return jnp.maximum(acc + bias, 0.0)

        h1 = conv(x, R_W1, EMBED, C1, R_B1)                       # (M, 64)
        h2 = conv(h1, R_W2, C1, C2, R_B2)                         # (M, 32)

        # ---- global max-pool over the sequence axis (per batch) ------------
        feat = jnp.max(h2.reshape(B, L, C2), axis=1)              # (B, 32)

        # ---- MLP head: linear1 -> ReLU -> linear2 (dropout = identity) -----
        w1 = slab_ref[R_L1W:R_L1W + INN_FEA, 0:HID]
        b1 = slab_ref[R_L1B:R_L1B + 1, 0:HID]
        h = jnp.maximum(
            jnp.dot(feat, w1, preferred_element_type=f32) + b1, 0.0)
        w2 = slab_ref[R_L2W:R_L2W + HID, 0:NUM_CLASSES]
        b2 = slab_ref[R_L2B:R_L2B + 1, 0:NUM_CLASSES]
        out_ref[...] = jnp.dot(h, w2, preferred_element_type=f32) + b2

    return kernel


@jax.jit
def forward(tokens, slab):
    B, L = tokens.shape
    M = B * L
    kernel = _make_fused_kernel(B, L)

    # Advisory cost hint for the XLA scheduler.
    flops = 2 * M * V_PAD * EMBED
    flops += KMAX * 2 * M * EMBED * C1
    flops += KMAX * 2 * M * C1 * C2
    flops += 2 * (KMAX - 1) * 2 * M * M * C1          # shift-matrix applies
    flops += 2 * B * (INN_FEA * HID + HID * NUM_CLASSES)
    bytes_accessed = M * 4 + R_TOT * LANES * 4 + B * NUM_CLASSES * 4

    vmem = pl.BlockSpec(memory_space=pltpu.MemorySpace.VMEM)
    return pl.pallas_call(
        kernel,
        out_shape=jax.ShapeDtypeStruct((B, NUM_CLASSES), jnp.float32),
        in_specs=[vmem, vmem],
        out_specs=vmem,
        cost_estimate=pl.CostEstimate(
            flops=flops, transcendentals=0, bytes_accessed=bytes_accessed),
    )(tokens.reshape(M, 1), slab)


# --------------------- pure-JAX reference (for checking) --------------------
def reference(tokens, params):
    emb = params['emb'][tokens]
    x = emb[:, None, :, :]                           # (B, 1, L, E)  NCHW
    feats = []
    for i, k in enumerate(FILTER_SIZES):
        p = k // 2
        w1, b1 = params['conv1_w'][i], params['conv1_b'][i]
        w2, b2 = params['conv2_w'][i], params['conv2_b'][i]
        wt1 = jnp.transpose(w1, (2, 0, 1))[:, None]  # (E, 1, k, E) OIHW
        y = lax.conv_general_dilated(
            x, wt1, (1, 1), ((p, p), (0, 0)),
            dimension_numbers=('NCHW', 'OIHW', 'NCHW'))
        y = jax.nn.relu(y + b1[None, :, None, None])[..., 0]   # (B, E, L1)
        y = jnp.transpose(y, (0, 2, 1))                         # (B, L1, E)
        wt2 = jnp.transpose(w2, (2, 0, 1))[:, None]             # (F, 1, k, E)
        z = lax.conv_general_dilated(
            y[:, None], wt2, (1, 1), ((p, p), (0, 0)),
            dimension_numbers=('NCHW', 'OIHW', 'NCHW'))
        z = jax.nn.relu(z + b2[None, :, None, None])[..., 0]    # (B, F, L2)
        feats.append(jnp.max(z, axis=2))
    feat = jnp.concatenate(feats, axis=1)
    h = jax.nn.relu(feat @ params['lin1_w'] + params['lin1_b'])
    return h @ params['lin2_w'] + params['lin2_b']


# ------------------------------- setup ---------------------------------------
def init_params(key):
    ks = jax.random.split(key, 16)
    p = {}
    emb = 0.1 * jax.random.normal(ks[0], (N_VOCAB, EMBED), jnp.float32)
    p['emb'] = emb.at[N_VOCAB - 1].set(0.0)          # padding_idx row zeroed
    p['conv1_w'], p['conv1_b'] = [], []
    p['conv2_w'], p['conv2_b'] = [], []
    for i, k in enumerate(FILTER_SIZES):
        p['conv1_w'].append(0.1 * jax.random.normal(
            ks[1 + i], (k, EMBED, EMBED), jnp.float32))
        p['conv1_b'].append(0.01 * jax.random.normal(
            ks[3 + i], (EMBED,), jnp.float32))
        p['conv2_w'].append(0.1 * jax.random.normal(
            ks[5 + i], (k, EMBED, NUM_FILTERS), jnp.float32))
        p['conv2_b'].append(0.01 * jax.random.normal(
            ks[7 + i], (NUM_FILTERS,), jnp.float32))
    p['lin1_w'] = 0.1 * jax.random.normal(ks[9], (INN_FEA, HID), jnp.float32)
    p['lin1_b'] = 0.01 * jax.random.normal(ks[10], (HID,), jnp.float32)
    p['lin2_w'] = 0.1 * jax.random.normal(ks[11], (HID, NUM_CLASSES), jnp.float32)
    p['lin2_b'] = 0.01 * jax.random.normal(ks[12], (NUM_CLASSES,), jnp.float32)
    return p


if __name__ == "__main__":
    key = jax.random.PRNGKey(0)
    pkey, tkey = jax.random.split(key)
    params = init_params(pkey)
    # The PyTorch forward consumes x[0] (the token ids); we pass them directly.
    tokens = jax.random.randint(tkey, (BATCH, SEQ_LEN), 0, N_VOCAB, jnp.int32)

    slab = jax.block_until_ready(pack_params(params))   # one-time packing

    out = jax.block_until_ready(forward(tokens, slab))

    ref = reference(tokens, params)
    assert out.shape == (BATCH, NUM_CLASSES), out.shape
    assert jnp.allclose(out, ref, atol=1e-3, rtol=1e-3), (out, ref)
    print("KERNEL_OK")
</pallas_src>

<mosaic_0001>
module attributes {stable_mosaic.version = 11 : i64} {
  func.func @kernel(%arg0: memref<16x1xi32, #tpu.memory_space<vmem>>, %arg1: memref<616x128xf32, #tpu.memory_space<vmem>>, %arg2: memref<2x4xf32, #tpu.memory_space<vmem>>) attributes {dimension_semantics = [], scalar_prefetch = 0 : i64, scratch_operands = 0 : i64, tpu.core_type = #tpu.core_type<tc>} {
    %c0 = arith.constant 0 : index
    %c0_0 = arith.constant 0 : index
    %0 = vector.load %arg0[%c0, %c0_0] : memref<16x1xi32, #tpu.memory_space<vmem>>, vector<16x1xi32>
    %1 = tpu.iota {dimensions = array<i32: 1>} : vector<16x56xi32>
    %2 = vector.broadcast %0 : vector<16x1xi32> to vector<16x56xi32>
    %3 = arith.cmpi eq, %2, %1 : vector<16x56xi32>
    %4 = arith.extui %3 : vector<16x56xi1> to vector<16x56xi32>
    %5 = arith.sitofp %4 : vector<16x56xi32> to vector<16x56xf32>
    %c0_1 = arith.constant 0 : index
    %c0_2 = arith.constant 0 : index
    %6 = vector.load %arg1[%c0_1, %c0_2] : memref<616x128xf32, #tpu.memory_space<vmem>>, vector<56x32xf32>
    %cst = arith.constant dense<0.000000e+00> : vector<16x32xf32>
    %7 = tpu.matmul %5, %6, %cst {dimension_numbers = #tpu.dot_dimension_numbers<[1], [0], [0], [1], [0, 0, 1, 1], [], []>} : vector<16x56xf32>, vector<56x32xf32>, vector<16x32xf32> -> vector<16x32xf32>
    %8 = tpu.iota {dimensions = array<i32: 0>} : vector<16x16xi32>
    %9 = tpu.iota {dimensions = array<i32: 1>} : vector<16x16xi32>
    %c8_i32 = arith.constant 8 : i32
    %c0_i32 = arith.constant 0 : i32
    %10 = arith.cmpi eq, %c8_i32, %c0_i32 : i32
    %c1_i32 = arith.constant 1 : i32
    %11 = arith.select %10, %c1_i32, %c8_i32 : i32
    %12 = vector.broadcast %11 : i32 to vector<16x16xi32>
    %13 = arith.remsi %8, %12 : vector<16x16xi32>
    %c0_i32_3 = arith.constant 0 : i32
    %14 = vector.broadcast %c0_i32_3 : i32 to vector<16x16xi32>
    %15 = arith.cmpi ne, %13, %14 : vector<16x16xi32>
    %c0_i32_4 = arith.constant 0 : i32
    %16 = vector.broadcast %c0_i32_4 : i32 to vector<16x16xi32>
    %17 = arith.cmpi slt, %13, %16 : vector<16x16xi32>
    %c0_i32_5 = arith.constant 0 : i32
    %18 = arith.cmpi slt, %11, %c0_i32_5 : i32
    %19 = vector.broadcast %18 : i1 to vector<16x16xi1>
    %20 = vector.broadcast %19 : vector<16x16xi1> to vector<16x16xi1>
    %21 = arith.xori %17, %20 : vector<16x16xi1>
    %22 = arith.andi %21, %15 : vector<16x16xi1>
    %23 = vector.broadcast %11 : i32 to vector<16x16xi32>
    %24 = arith.addi %13, %23 : vector<16x16xi32>
    %25 = arith.select %22, %24, %13 : vector<16x16xi1>, vector<16x16xi32>
    %c-2_i32 = arith.constant -2 : i32
    %26 = vector.broadcast %c-2_i32 : i32 to vector<16x16xi32>
    %27 = arith.addi %25, %26 : vector<16x16xi32>
    %c0_i32_6 = arith.constant 0 : i32
    %28 = vector.broadcast %c0_i32_6 : i32 to vector<16x16xi32>
    %29 = arith.cmpi sge, %27, %28 : vector<16x16xi32>
    %c-2_i32_7 = arith.constant -2 : i32
    %30 = vector.broadcast %c-2_i32_7 : i32 to vector<16x16xi32>
    %31 = arith.addi %25, %30 : vector<16x16xi32>
    %c8_i32_8 = arith.constant 8 : i32
    %32 = vector.broadcast %c8_i32_8 : i32 to vector<16x16xi32>
    %33 = arith.cmpi slt, %31, %32 : vector<16x16xi32>
    %34 = arith.andi %29, %33 : vector<16x16xi1>
    %c-2_i32_9 = arith.constant -2 : i32
    %35 = vector.broadcast %c-2_i32_9 : i32 to vector<16x16xi32>
    %36 = arith.addi %8, %35 : vector<16x16xi32>
    %37 = arith.cmpi eq, %9, %36 : vector<16x16xi32>
    %38 = arith.andi %37, %34 : vector<16x16xi1>
    %39 = arith.extui %38 : vector<16x16xi1> to vector<16x16xi32>
    %40 = arith.sitofp %39 : vector<16x16xi32> to vector<16x16xf32>
    %c-1_i32 = arith.constant -1 : i32
    %41 = vector.broadcast %c-1_i32 : i32 to vector<16x16xi32>
    %42 = arith.addi %25, %41 : vector<16x16xi32>
    %c0_i32_10 = arith.constant 0 : i32
    %43 = vector.broadcast %c0_i32_10 : i32 to vector<16x16xi32>
    %44 = arith.cmpi sge, %42, %43 : vector<16x16xi32>
    %c-1_i32_11 = arith.constant -1 : i32
    %45 = vector.broadcast %c-1_i32_11 : i32 to vector<16x16xi32>
    %46 = arith.addi %25, %45 : vector<16x16xi32>
    %c8_i32_12 = arith.constant 8 : i32
    %47 = vector.broadcast %c8_i32_12 : i32 to vector<16x16xi32>
    %48 = arith.cmpi slt, %46, %47 : vector<16x16xi32>
    %49 = arith.andi %44, %48 : vector<16x16xi1>
    %c-1_i32_13 = arith.constant -1 : i32
    %50 = vector.broadcast %c-1_i32_13 : i32 to vector<16x16xi32>
    %51 = arith.addi %8, %50 : vector<16x16xi32>
    %52 = arith.cmpi eq, %9, %51 : vector<16x16xi32>
    %53 = arith.andi %52, %49 : vector<16x16xi1>
    %54 = arith.extui %53 : vector<16x16xi1> to vector<16x16xi32>
    %55 = arith.sitofp %54 : vector<16x16xi32> to vector<16x16xf32>
    %c1_i32_14 = arith.constant 1 : i32
    %56 = vector.broadcast %c1_i32_14 : i32 to vector<16x16xi32>
    %57 = arith.addi %25, %56 : vector<16x16xi32>
    %c0_i32_15 = arith.constant 0 : i32
    %58 = vector.broadcast %c0_i32_15 : i32 to vector<16x16xi32>
    %59 = arith.cmpi sge, %57, %58 : vector<16x16xi32>
    %c1_i32_16 = arith.constant 1 : i32
    %60 = vector.broadcast %c1_i32_16 : i32 to vector<16x16xi32>
    %61 = arith.addi %25, %60 : vector<16x16xi32>
    %c8_i32_17 = arith.constant 8 : i32
    %62 = vector.broadcast %c8_i32_17 : i32 to vector<16x16xi32>
    %63 = arith.cmpi slt, %61, %62 : vector<16x16xi32>
    %64 = arith.andi %59, %63 : vector<16x16xi1>
    %c1_i32_18 = arith.constant 1 : i32
    %65 = vector.broadcast %c1_i32_18 : i32 to vector<16x16xi32>
    %66 = arith.addi %8, %65 : vector<16x16xi32>
    %67 = arith.cmpi eq, %9, %66 : vector<16x16xi32>
    %68 = arith.andi %67, %64 : vector<16x16xi1>
    %69 = arith.extui %68 : vector<16x16xi1> to vector<16x16xi32>
    %70 = arith.sitofp %69 : vector<16x16xi32> to vector<16x16xf32>
    %c2_i32 = arith.constant 2 : i32
    %71 = vector.broadcast %c2_i32 : i32 to vector<16x16xi32>
    %72 = arith.addi %25, %71 : vector<16x16xi32>
    %c0_i32_19 = arith.constant 0 : i32
    %73 = vector.broadcast %c0_i32_19 : i32 to vector<16x16xi32>
    %74 = arith.cmpi sge, %72, %73 : vector<16x16xi32>
    %c2_i32_20 = arith.constant 2 : i32
    %75 = vector.broadcast %c2_i32_20 : i32 to vector<16x16xi32>
    %76 = arith.addi %25, %75 : vector<16x16xi32>
    %c8_i32_21 = arith.constant 8 : i32
    %77 = vector.broadcast %c8_i32_21 : i32 to vector<16x16xi32>
    %78 = arith.cmpi slt, %76, %77 : vector<16x16xi32>
    %79 = arith.andi %74, %78 : vector<16x16xi1>
    %c2_i32_22 = arith.constant 2 : i32
    %80 = vector.broadcast %c2_i32_22 : i32 to vector<16x16xi32>
    %81 = arith.addi %8, %80 : vector<16x16xi32>
    %82 = arith.cmpi eq, %9, %81 : vector<16x16xi32>
    %83 = arith.andi %82, %79 : vector<16x16xi1>
    %84 = arith.extui %83 : vector<16x16xi1> to vector<16x16xi32>
    %85 = arith.sitofp %84 : vector<16x16xi32> to vector<16x16xf32>
    %cst_23 = arith.constant dense<0.000000e+00> : vector<16x32xf32>
    %86 = tpu.matmul %40, %7, %cst_23 {dimension_numbers = #tpu.dot_dimension_numbers<[1], [0], [0], [1], [0, 0, 1, 1], [], []>} : vector<16x16xf32>, vector<16x32xf32>, vector<16x32xf32> -> vector<16x32xf32>
    %c56 = arith.constant 56 : index
    %c0_24 = arith.constant 0 : index
    %87 = vector.load %arg1[%c56, %c0_24] : memref<616x128xf32, #tpu.memory_space<vmem>>, vector<32x64xf32>
    %cst_25 = arith.constant dense<0.000000e+00> : vector<16x64xf32>
    %88 = tpu.matmul %86, %87, %cst_25 {dimension_numbers = #tpu.dot_dimension_numbers<[1], [0], [0], [1], [0, 0, 1, 1], [], []>} : vector<16x32xf32>, vector<32x64xf32>, vector<16x64xf32> -> vector<16x64xf32>
    %cst_26 = arith.constant dense<0.000000e+00> : vector<16x32xf32>
    %89 = tpu.matmul %55, %7, %cst_26 {dimension_numbers = #tpu.dot_dimension_numbers<[1], [0], [0], [1], [0, 0, 1, 1], [], []>} : vector<16x16xf32>, vector<16x32xf32>, vector<16x32xf32> -> vector<16x32xf32>
    %c88 = arith.constant 88 : index
    %c0_27 = arith.constant 0 : index
    %90 = vector.load %arg1[%c88, %c0_27] : memref<616x128xf32, #tpu.memory_space<vmem>>, vector<32x64xf32>
    %cst_28 = arith.constant dense<0.000000e+00> : vector<16x64xf32>
    %91 = tpu.matmul %89, %90, %cst_28 {dimension_numbers = #tpu.dot_dimension_numbers<[1], [0], [0], [1], [0, 0, 1, 1], [], []>} : vector<16x32xf32>, vector<32x64xf32>, vector<16x64xf32> -> vector<16x64xf32>
    %92 = arith.addf %88, %91 : vector<16x64xf32>
    %c120 = arith.constant 120 : index
    %c0_29 = arith.constant 0 : index
    %93 = vector.load %arg1[%c120, %c0_29] : memref<616x128xf32, #tpu.memory_space<vmem>>, vector<32x64xf32>
    %cst_30 = arith.constant dense<0.000000e+00> : vector<16x64xf32>
    %94 = tpu.matmul %7, %93, %cst_30 {dimension_numbers = #tpu.dot_dimension_numbers<[1], [0], [0], [1], [0, 0, 1, 1], [], []>} : vector<16x32xf32>, vector<32x64xf32>, vector<16x64xf32> -> vector<16x64xf32>
    %95 = arith.addf %92, %94 : vector<16x64xf32>
    %cst_31 = arith.constant dense<0.000000e+00> : vector<16x32xf32>
    %96 = tpu.matmul %70, %7, %cst_31 {dimension_numbers = #tpu.dot_dimension_numbers<[1], [0], [0], [1], [0, 0, 1, 1], [], []>} : vector<16x16xf32>, vector<16x32xf32>, vector<16x32xf32> -> vector<16x32xf32>
    %c152 = arith.constant 152 : index
    %c0_32 = arith.constant 0 : index
    %97 = vector.load %arg1[%c152, %c0_32] : memref<616x128xf32, #tpu.memory_space<vmem>>, vector<32x64xf32>
    %cst_33 = arith.constant dense<0.000000e+00> : vector<16x64xf32>
    %98 = tpu.matmul %96, %97, %cst_33 {dimension_numbers = #tpu.dot_dimension_numbers<[1], [0], [0], [1], [0, 0, 1, 1], [], []>} : vector<16x32xf32>, vector<32x64xf32>, vector<16x64xf32> -> vector<16x64xf32>
    %99 = arith.addf %95, %98 : vector<16x64xf32>
    %cst_34 = arith.constant dense<0.000000e+00> : vector<16x32xf32>
    %100 = tpu.matmul %85, %7, %cst_34 {dimension_numbers = #tpu.dot_dimension_numbers<[1], [0], [0], [1], [0, 0, 1, 1], [], []>} : vector<16x16xf32>, vector<16x32xf32>, vector<16x32xf32> -> vector<16x32xf32>
    %c184 = arith.constant 184 : index
    %c0_35 = arith.constant 0 : index
    %101 = vector.load %arg1[%c184, %c0_35] : memref<616x128xf32, #tpu.memory_space<vmem>>, vector<32x64xf32>
    %cst_36 = arith.constant dense<0.000000e+00> : vector<16x64xf32>
    %102 = tpu.matmul %100, %101, %cst_36 {dimension_numbers = #tpu.dot_dimension_numbers<[1], [0], [0], [1], [0, 0, 1, 1], [], []>} : vector<16x32xf32>, vector<32x64xf32>, vector<16x64xf32> -> vector<16x64xf32>
    %103 = arith.addf %99, %102 : vector<16x64xf32>
    %c216 = arith.constant 216 : index
    %c0_37 = arith.constant 0 : index
    %104 = vector.load %arg1[%c216, %c0_37] : memref<616x128xf32, #tpu.memory_space<vmem>>, vector<1x64xf32>
    %105 = vector.broadcast %104 : vector<1x64xf32> to vector<16x64xf32>
    %106 = arith.addf %103, %105 : vector<16x64xf32>
    %cst_38 = arith.constant 0.000000e+00 : f32
    %107 = vector.broadcast %cst_38 : f32 to vector<16x64xf32>
    %108 = arith.maximumf %106, %107 : vector<16x64xf32>
    %cst_39 = arith.constant dense<0.000000e+00> : vector<16x64xf32>
    %109 = tpu.matmul %40, %108, %cst_39 {dimension_numbers = #tpu.dot_dimension_numbers<[1], [0], [0], [1], [0, 0, 1, 1], [], []>} : vector<16x16xf32>, vector<16x64xf32>, vector<16x64xf32> -> vector<16x64xf32>
    %c224 = arith.constant 224 : index
    %c0_40 = arith.constant 0 : index
    %110 = vector.load %arg1[%c224, %c0_40] : memref<616x128xf32, #tpu.memory_space<vmem>>, vector<64x32xf32>
    %cst_41 = arith.constant dense<0.000000e+00> : vector<16x32xf32>
    %111 = tpu.matmul %109, %110, %cst_41 {dimension_numbers = #tpu.dot_dimension_numbers<[1], [0], [0], [1], [0, 0, 1, 1], [], []>} : vector<16x64xf32>, vector<64x32xf32>, vector<16x32xf32> -> vector<16x32xf32>
    %cst_42 = arith.constant dense<0.000000e+00> : vector<16x64xf32>
    %112 = tpu.matmul %55, %108, %cst_42 {dimension_numbers = #tpu.dot_dimension_numbers<[1], [0], [0], [1], [0, 0, 1, 1], [], []>} : vector<16x16xf32>, vector<16x64xf32>, vector<16x64xf32> -> vector<16x64xf32>
    %c288 = arith.constant 288 : index
    %c0_43 = arith.constant 0 : index
    %113 = vector.load %arg1[%c288, %c0_43] : memref<616x128xf32, #tpu.memory_space<vmem>>, vector<64x32xf32>
    %cst_44 = arith.constant dense<0.000000e+00> : vector<16x32xf32>
    %114 = tpu.matmul %112, %113, %cst_44 {dimension_numbers = #tpu.dot_dimension_numbers<[1], [0], [0], [1], [0, 0, 1, 1], [], []>} : vector<16x64xf32>, vector<64x32xf32>, vector<16x32xf32> -> vector<16x32xf32>
    %115 = arith.addf %111, %114 : vector<16x32xf32>
    %c352 = arith.constant 352 : index
    %c0_45 = arith.constant 0 : index
    %116 = vector.load %arg1[%c352, %c0_45] : memref<616x128xf32, #tpu.memory_space<vmem>>, vector<64x32xf32>
    %cst_46 = arith.constant dense<0.000000e+00> : vector<16x32xf32>
    %117 = tpu.matmul %108, %116, %cst_46 {dimension_numbers = #tpu.dot_dimension_numbers<[1], [0], [0], [1], [0, 0, 1, 1], [], []>} : vector<16x64xf32>, vector<64x32xf32>, vector<16x32xf32> -> vector<16x32xf32>
    %118 = arith.addf %115, %117 : vector<16x32xf32>
    %cst_47 = arith.constant dense<0.000000e+00> : vector<16x64xf32>
    %119 = tpu.matmul %70, %108, %cst_47 {dimension_numbers = #tpu.dot_dimension_numbers<[1], [0], [0], [1], [0, 0, 1, 1], [], []>} : vector<16x16xf32>, vector<16x64xf32>, vector<16x64xf32> -> vector<16x64xf32>
    %c416 = arith.constant 416 : index
    %c0_48 = arith.constant 0 : index
    %120 = vector.load %arg1[%c416, %c0_48] : memref<616x128xf32, #tpu.memory_space<vmem>>, vector<64x32xf32>
    %cst_49 = arith.constant dense<0.000000e+00> : vector<16x32xf32>
    %121 = tpu.matmul %119, %120, %cst_49 {dimension_numbers = #tpu.dot_dimension_numbers<[1], [0], [0], [1], [0, 0, 1, 1], [], []>} : vector<16x64xf32>, vector<64x32xf32>, vector<16x32xf32> -> vector<16x32xf32>
    %122 = arith.addf %118, %121 : vector<16x32xf32>
    %cst_50 = arith.constant dense<0.000000e+00> : vector<16x64xf32>
    %123 = tpu.matmul %85, %108, %cst_50 {dimension_numbers = #tpu.dot_dimension_numbers<[1], [0], [0], [1], [0, 0, 1, 1], [], []>} : vector<16x16xf32>, vector<16x64xf32>, vector<16x64xf32> -> vector<16x64xf32>
    %c480 = arith.constant 480 : index
    %c0_51 = arith.constant 0 : index
    %124 = vector.load %arg1[%c480, %c0_51] : memref<616x128xf32, #tpu.memory_space<vmem>>, vector<64x32xf32>
    %cst_52 = arith.constant dense<0.000000e+00> : vector<16x32xf32>
    %125 = tpu.matmul %123, %124, %cst_52 {dimension_numbers = #tpu.dot_dimension_numbers<[1], [0], [0], [1], [0, 0, 1, 1], [], []>} : vector<16x64xf32>, vector<64x32xf32>, vector<16x32xf32> -> vector<16x32xf32>
    %126 = arith.addf %122, %125 : vector<16x32xf32>
    %c544 = arith.constant 544 : index
    %c0_53 = arith.constant 0 : index
    %127 = vector.load %arg1[%c544, %c0_53] : memref<616x128xf32, #tpu.memory_space<vmem>>, vector<1x32xf32>
    %128 = vector.broadcast %127 : vector<1x32xf32> to vector<16x32xf32>
    %129 = arith.addf %126, %128 : vector<16x32xf32>
    %cst_54 = arith.constant 0.000000e+00 : f32
    %130 = vector.broadcast %cst_54 : f32 to vector<16x32xf32>
    %131 = arith.maximumf %129, %130 : vector<16x32xf32>
    %132 = vector.shape_cast %131 : vector<16x32xf32> to vector<2x8x32xf32>
    %cst_55 = arith.constant dense<0xFF800000> : vector<2x32xf32>
    %133 = vector.multi_reduction <maximumf>, %132, %cst_55 [1] : vector<2x8x32xf32> to vector<2x32xf32>
    %c552 = arith.constant 552 : index
    %c0_56 = arith.constant 0 : index
    %134 = vector.load %arg1[%c552, %c0_56] : memref<616x128xf32, #tpu.memory_space<vmem>>, vector<32x16xf32>
    %c584 = arith.constant 584 : index
    %c0_57 = arith.constant 0 : index
    %135 = vector.load %arg1[%c584, %c0_57] : memref<616x128xf32, #tpu.memory_space<vmem>>, vector<1x16xf32>
    %cst_58 = arith.constant dense<0.000000e+00> : vector<2x16xf32>
    %136 = tpu.matmul %133, %134, %cst_58 {dimension_numbers = #tpu.dot_dimension_numbers<[1], [0], [0], [1], [0, 0, 1, 1], [], []>} : vector<2x32xf32>, vector<32x16xf32>, vector<2x16xf32> -> vector<2x16xf32>
    %137 = vector.broadcast %135 : vector<1x16xf32> to vector<2x16xf32>
    %138 = arith.addf %136, %137 : vector<2x16xf32>
    %cst_59 = arith.constant 0.000000e+00 : f32
    %139 = vector.broadcast %cst_59 : f32 to vector<2x16xf32>
    %140 = arith.maximumf %138, %139 : vector<2x16xf32>
    %c592 = arith.constant 592 : index
    %c0_60 = arith.constant 0 : index
    %141 = vector.load %arg1[%c592, %c0_60] : memref<616x128xf32, #tpu.memory_space<vmem>>, vector<16x4xf32>
    %c608 = arith.constant 608 : index
    %c0_61 = arith.constant 0 : index
    %142 = vector.load %arg1[%c608, %c0_61] : memref<616x128xf32, #tpu.memory_space<vmem>>, vector<1x4xf32>
    %cst_62 = arith.constant dense<0.000000e+00> : vector<2x4xf32>
    %143 = tpu.matmul %140, %141, %cst_62 {dimension_numbers = #tpu.dot_dimension_numbers<[1], [0], [0], [1], [0, 0, 1, 1], [], []>} : vector<2x16xf32>, vector<16x4xf32>, vector<2x4xf32> -> vector<2x4xf32>
    %144 = vector.broadcast %142 : vector<1x4xf32> to vector<2x4xf32>
    %145 = arith.addf %143, %144 : vector<2x4xf32>
    %c0_63 = arith.constant 0 : index
    %c0_64 = arith.constant 0 : index
    %146 = vector.load %arg2[%c0_63, %c0_64] : memref<2x4xf32, #tpu.memory_space<vmem>>, vector<2x4xf32>
    tpu.vector_store %arg2[%c0_63, %c0_64], %145 {strides = array<i32>} : memref<2x4xf32, #tpu.memory_space<vmem>>, vector<2x4xf32>,
    return
  }
}

</mosaic_0001>

<bundles_post_ra>
// kernel: forward.1
= control target key start
LH: loop header
LB: loop body
LE: loop exit
PB: predicated region body
PF: predicated region fallthrough
CT: control target
= control target key end

     0   :  { %7 = vsyncpa [#allocation3], 0  ;;  %s1125_s0 = inlined_call_operand.vmem [shape: s32[16,1], index: 0, kind: input, shape index: {}]   ;;  %s1126_s1 = inlined_call_operand.hbm [shape: f32[616,128], index: 1, kind: input, shape index: {}]   ;;  %s1127_s2 = inlined_call_operand.hbm [shape: f32[2,4], index: 2, kind: output, shape index: {}]  }
   0x1   :  { %8 = vsyncpa [#allocation4], 0  ;;  %s15_s11 = sshll.u32 %s1126_s1, 4  ;;  %s971_s12 = smov [#allocation2]   ;;  %s16_s11 = int_to_ptr.hbm [resolvable:$true] %s15_s11 }
   0x2   :  { %s17_s13 = sshll.u32 %s971_s12, 4  ;;  %s972_s14 = smov 128   ;;  %s18_s13 = int_to_ptr.vmem [resolvable:$true] %s17_s13 }
   0x3   :  { %s973_s15 = smov 8  }
   0x4   :  { %23 = dma.hbm_to_vmem [thread:$0]  %s16_s11, 9856, %s18_s13, [#allocation3], %s972_s14, %s972_s14, %s973_s15  }
   0x5   :  { %967 = dma.done.wait [#allocation3], 9856  }
   0x6   :  { %968 = vsyncadd [#allocation3], 4294957440  ;;  %v974_v0 = vmov 0   ;;  %v28_v1 = vld [vmem:[%s1125_s0] sm:$0xff]  ;;  %v50_v2 = vld [vmem:[#allocation2 + $0x30] sm:$0xff]  ;;  %v30_v10 = vlaneseq  ;;  %vm51_vm0 = vcmask 457728  }
   0x7   :  { %914 = vset.pattern.permute.xlu0 %v974_v0  ;;  %67 = vmatpush.msra.mxu0 %v50_v2  ;;  %v49_v3 = vld [vmem:[#allocation2 + $0x28] sm:$0xff]  ;;  %v48_v4 = vld [vmem:[#allocation2 + $0x20] sm:$0xff]  ;;  %v47_v5 = vld [vmem:[#allocation2 + $0x18] sm:$0xff]  ;;  %v975_v13 = vmov 0.0   ;;  %vm180_vm9 = vcmask 130048   ;;  %s848_s22 = sshll.u32 %s1127_s2, 4  ;;  %s849_s22 = int_to_ptr.hbm [resolvable:$true] %s848_s22 }
   0x8   :  { %33 = vperm.xlu0 %914, %v28_v1   ;;  %v29_v6 = vld [vmem:[%s1125_s0 + $0x8] sm:$0xff]  ;;  %v46_v7 = vld [vmem:[#allocation2 + $0x10] sm:$0xff]  ;;  %v44_v9 = vld [vmem:[#allocation2] sm:$0xff]  ;;  %v1001_v11 = vand.u32 127, %v30_v10  ;;  %v1007_v21 = vshrl.u32 %v30_v10, 7  ;;  %s976_s0 = smov [#allocation5]  }
   0x9   :  { %68 = vmatpush.msra.mxu0 %v49_v3  ;;  %v45_v8 = vld [vmem:[#allocation2 + $0x8] sm:$0xff]  ;;  %v246_v17 = vld [vmem:[#allocation2 + $0x70] sm:$0xff]  ;;  %v244_v19 = vld [vmem:[#allocation2 + $0x60] sm:$0xff]  ;;  %s846_s19 = sshll.u32 %s976_s0, 4  ;;  %s847_s19 = int_to_ptr.vmem [resolvable:$true] %s846_s19 }
   0xa   :  { %v245_v18 = vld [vmem:[#allocation2 + $0x68] sm:$0xff]  ;;  %266 = vmatpush.msra.mxu3 %v246_v17  ;;  %v243_v20 = vld [vmem:[#allocation2 + $0x58] sm:$0xff]  ;;  %v1010_v22 = vand.u32 7, %v1007_v21  ;;  %v134_v24 = vadd.s32 4294967295, %v1007_v21  ;;  %v1015_v25 = vadd.s32 8, %v1007_v21  ;;  %v116_v28 = vadd.s32 4294967294, %v1007_v21 }
   0xb   :  { %69 = vmatpush.msra.mxu0 %v48_v4  ;;  %v213_v34 = vld [vmem:[#allocation2 + $0x50] sm:$0xff]  ;;  %v212_v39 = vld [vmem:[#allocation2 + $0x48] sm:$0xff]  ;;  %v211_v41 = vld [vmem:[#allocation2 + $0x40] sm:$0xff]  ;;  %v170_v50 = vadd.s32 2, %v1007_v21  ;;  %v152_v52 = vadd.s32 1, %v1007_v21 }
   0xc   :  { %267 = vmatpush.msra.mxu3 %v245_v18  ;;  %v126_v23 = vadd.s32 4294967295, %v1010_v22  ;;  %v108_v27 = vadd.s32 4294967294, %v1010_v22  ;;  %vm136_vm4 = vcmp.eq.s32.totalorder %v1001_v11, %v134_v24  ;;  %v1021_v29 = vand.u32 7, %v1015_v25  ;;  %v309_v35 = vld [vmem:[#allocation2 + $0x90] sm:$0xff]  ;;  %v308_v40 = vld [vmem:[#allocation2 + $0x88] sm:$0xff]  ;;  %v307_v42 = vld [vmem:[#allocation2 + $0x80] sm:$0xff] }
   0xd   :  { %70 = vmatpush.msra.mxu0 %v47_v5  ;;  %vm118_vm6 = vcmp.eq.s32.totalorder %v1001_v11, %v116_v28  ;;  %v135_v31 = vadd.s32 4294967295, %v1015_v25  ;;  %v117_v37 = vadd.s32 4294967294, %v1015_v25  ;;  %v210_v43 = vld [vmem:[#allocation2 + $0x38] sm:$0xff]  ;;  %v162_v49 = vadd.s32 2, %v1010_v22  ;;  %v437_v63 = vld [vmem:[#allocation2 + $0xd0] sm:$0xff]  ;;  %v436_v0 = vld [vmem:[#allocation2 + $0xc8] sm:$0xff] }
   0xe   :  { %268 = vmatpush.msra.mxu3 %v244_v19  ;;  %vm128_vm3 = vcmp.ge.s32.totalorder %v126_v23, 0  ;;  %vm110_vm5 = vcmp.ge.s32.totalorder %v108_v27, 0  ;;  %v127_v30 = vadd.s32 4294967295, %v1021_v29  ;;  %v109_v36 = vadd.s32 4294967294, %v1021_v29  ;;  %v306_v44 = vld [vmem:[#allocation2 + $0x78] sm:$0xff]  ;;  %v373_v1 = vld [vmem:[#allocation2 + $0xb0] sm:$0xff] }
   0xf   :  { %71 = vmatpush.msra.mxu0 %v46_v7  ;;  %vm138_vm7 = vmand %vm136_vm4, %vm128_vm3  ;;  %vm137_vm11 = vcmp.eq.s32.totalorder %v1001_v11, %v135_v31  ;;  %vm119_vm14 = vcmp.eq.s32.totalorder %v1001_v11, %v117_v37  ;;  %v144_v51 = vadd.s32 1, %v1010_v22  ;;  %vm154_vm4 = vcmp.eq.s32.totalorder %v1001_v11, %v152_v52  ;;  %v435_v2 = vld [vmem:[#allocation2 + $0xc0] sm:$0xff]  ;;  %v372_v3 = vld [vmem:[#allocation2 + $0xa8] sm:$0xff] }
  0x10   :  { %36 = vperm.xlu0 %914, %v29_v6   ;;  %269 = vmatpush.msra.mxu3 %v243_v20  ;;  %vm120_vm8 = vmand %vm118_vm6, %vm110_vm5  ;;  %v1027_v33 = vsel %vm138_vm7, 1.0, %v975_v13  ;;  %vm129_vm10 = vcmp.ge.s32.totalorder %v127_v30, 0  ;;  %vm111_vm13 = vcmp.ge.s32.totalorder %v109_v36, 0  ;;  %v163_v55 = vadd.s32 2, %v1021_v29  ;;  %v434_v4 = vld [vmem:[#allocation2 + $0xb8] sm:$0xff]  ;;  %v371_v5 = vld [vmem:[#allocation2 + $0xa0] sm:$0xff] }
  0x11   :  { %72 = vmatpush.msra.mxu0 %v45_v8  ;;  %v1032_v38 = vsel %vm120_vm8, 1.0, %v975_v13  ;;  %vm139_vm12 = vmand %vm137_vm11, %vm129_vm10  ;;  %vm148_vm3 = vcmp.lt.s32.totalorder %v144_v51, 8  ;;  %v171_v56 = vadd.s32 2, %v1015_v25  ;;  %v145_v58 = vadd.s32 1, %v1021_v29  ;;  %v370_v6 = vld [vmem:[#allocation2 + $0x98] sm:$0xff]  ;;  %v504_v18 = vld [vmem:[#allocation2 + $0x110] sm:$0xff] }
  0x12   :  { %v1041_v45 = vsel %vm139_vm12, 1.0, %v975_v13  ;;  %vm121_vm15 = vmand %vm119_vm14, %vm111_vm13  ;;  %v153_v59 = vadd.s32 1, %v1015_v25  ;;  %vm167_vm7 = vcmp.lt.s32.totalorder %v163_v55, 8  ;;  %v505_v17 = vld [vmem:[#allocation2 + $0x118] sm:$0xff]  ;;  %v503_v19 = vld [vmem:[#allocation2 + $0x108] sm:$0xff]  ;;  %vm537_vm14 = vcmask 523264  }
  0x13   :  { %73 = vmatpush.msra.mxu0 %v44_v9  ;;  %v1046_v46 = vsel %vm121_vm15, 1.0, %v975_v13  ;;  %vm156_vm6 = vmand %vm154_vm4, %vm148_vm3  ;;  %vm173_vm8 = vcmp.eq.s32.totalorder %v1001_v11, %v171_v56  ;;  %vm149_vm10 = vcmp.lt.s32.totalorder %v145_v58, 8  ;;  %v502_v20 = vld [vmem:[#allocation2 + $0x100] sm:$0xff]  ;;  %v501_v21 = vld [vmem:[#allocation2 + $0xf8] sm:$0xff]  ;;  %vm787_vm15 = vcmask 1041409  }
  0x14   :  { %v1071_v60 = vsel %vm156_vm6, 1.0, %v975_v13  ;;  %vm155_vm11 = vcmp.eq.s32.totalorder %v1001_v11, %v153_v59  ;;  %vm175_vm12 = vmand %vm173_vm8, %vm167_vm7  ;;  %v500_v23 = vld [vmem:[#allocation2 + $0xf0] sm:$0xff]  ;;  %v499_v24 = vld [vmem:[#allocation2 + $0xe8] sm:$0xff] }
  0x15   :  { %vm157_vm13 = vmand %vm155_vm11, %vm149_vm10  ;;  %v1079_v61 = vsel %vm175_vm12, 1.0, %v975_v13  ;;  %392 = vmatpush.msrb.mxu0 %v373_v1  ;;  %v498_v25 = vld [vmem:[#allocation2 + $0xe0] sm:$0xff]  ;;  %v915_v36 = vld [vmem:[#allocation2 + $0xd8] ss:$0 sm:$0xff] }
  0x16   :  { %v1082_v62 = vsel %vm157_vm13, 1.0, %v975_v13  ;;  %v602_v51 = vld [vmem:[#allocation2 + $0x190] sm:$0xff]  ;;  %v532_v52 = vld [vmem:[#allocation2 + $0x138] sm:$0xff]  ;;  %v600_v55 = vld [vmem:[#allocation2 + $0x180] sm:$0xff] }
  0x17   :  { %393 = vmatpush.msrb.mxu0 %v372_v3  ;;  %v530_v56 = vld [vmem:[#allocation2 + $0x128] sm:$0xff]  ;;  %v599_v58 = vld [vmem:[#allocation2 + $0x178] sm:$0xff]  ;;  %v596_v59 = vld [vmem:[#allocation2 + $0x160] sm:$0xff] }
  0x18   :  { %v662_v1 = vld [vmem:[#allocation2 + $0x1c0] sm:$0xff]  ;;  %v660_v3 = vld [vmem:[#allocation2 + $0x1b0] sm:$0xff] }
  0x19   :  { %394 = vmatpush.msrb.mxu0 %v371_v5 }
  0x1b   :  { %395 = vmatpush.msrb.mxu0 %v370_v6 }
  0x7a   :  { %v34_v12 = vpop.permute.xlu0 %33 }
  0x7b   :  { %vm38_vm1 = vcmp.eq.s32.totalorder %v34_v12, %v1001_v11 }
  0x7c   :  { %v858_v14 = vsel %vm38_vm1, 1.0, %v975_v13  ;;  %vm166_vm1 = vcmp.lt.s32.totalorder %v162_v49, 8  ;;  %v603_v49 = vld [vmem:[#allocation2 + $0x198] sm:$0xff] }
  0x7d   :  { %860 = vmatmul.msk.f32.vlgmr.msra.gmra.mxu0 %vm51_vm0, %v858_v14 }
  0x82   :  { %v37_v15 = vpop.permute.xlu0 %36 }
  0x83   :  { %vm39_vm2 = vcmp.eq.s32.totalorder %v37_v15, %v1001_v11 }
  0x84   :  { %v859_v16 = vsel %vm39_vm2, 1.0, %v975_v13  ;;  %vm172_vm2 = vcmp.eq.s32.totalorder %v1001_v11, %v170_v50  ;;  %v533_v50 = vld [vmem:[#allocation2 + $0x140] sm:$0xff] }
  0x85   :  { %861 = vmatmul.msk.f32.gmra.mxu0 %vm51_vm0, %v859_v16  ;;  %vm247_vm0 = vcmask 261120   ;;  %vm174_vm5 = vmand %vm172_vm2, %vm166_vm1  ;;  %vm839_vm1 = vcmask 25600  }
  0x86   :  { %v1065_v57 = vsel %vm174_vm5, 1.0, %v975_v13 }
  0xfa   :  { %v75_v26 = vpop.f32.mrf.mxu0 }
 0x102   :  { %v78_v32 = vpop.f32.mrf.mxu0 }
 0x103   :  { %201 = vmatpush.msra.mxu1 %v78_v32  ;;  %234 = vmatpush.msra.mxu2 %v78_v32 }
 0x104   :  { %361 = vmatpush.msrb.mxu3 %v78_v32 }
 0x105   :  { %202 = vmatpush.msra.mxu1 %v75_v26  ;;  %235 = vmatpush.msra.mxu2 %v75_v26 }
 0x106   :  { %362 = vmatpush.msrb.mxu3 %v75_v26  ;;  %872 = vmatmul.msk.f32.vlgmr.msra.gmra.mxu2 %vm180_vm9, %v1027_v33 }
 0x107   :  { %295 = vmatpush.msrb.mxu1 %v213_v34  ;;  %328 = vmatpush.msrb.mxu2 %v309_v35 }
 0x108   :  { %870 = vmatmul.msk.f32.vlgmr.msra.gmra.mxu1 %vm180_vm9, %v1032_v38 }
 0x109   :  { %296 = vmatpush.msrb.mxu1 %v212_v39  ;;  %329 = vmatpush.msrb.mxu2 %v308_v40 }
 0x10b   :  { %297 = vmatpush.msrb.mxu1 %v211_v41  ;;  %330 = vmatpush.msrb.mxu2 %v307_v42  ;;  %v536_v42 = vld [vmem:[#allocation2 + $0x158] sm:$0xff] }
 0x10d   :  { %298 = vmatpush.msrb.mxu1 %v210_v43  ;;  %331 = vmatpush.msrb.mxu2 %v306_v44  ;;  %v535_v43 = vld [vmem:[#allocation2 + $0x150] sm:$0xff] }
 0x10e   :  { %873 = vmatmul.msk.f32.gmra.mxu2 %vm180_vm9, %v1041_v45 }
 0x10f   :  { %425 = vmatpush.msra.mxu1 %v78_v32  ;;  %456 = vmatpush.msra.mxu2 %v437_v63  ;;  %v664_v63 = vld [vmem:[#allocation2 + $0x1d0] sm:$0xff] }
 0x110   :  { %871 = vmatmul.msk.f32.gmra.mxu1 %vm180_vm9, %v1046_v46 }
 0x111   :  { %426 = vmatpush.msra.mxu1 %v75_v26  ;;  %457 = vmatpush.msra.mxu2 %v436_v0  ;;  %v663_v0 = vld [vmem:[#allocation2 + $0x1c8] sm:$0xff] }
 0x113   :  { %458 = vmatpush.msra.mxu2 %v435_v2  ;;  %v661_v2 = vld [vmem:[#allocation2 + $0x1b8] sm:$0xff] }
 0x115   :  { %459 = vmatpush.msra.mxu2 %v434_v4  ;;  %v658_v4 = vld [vmem:[#allocation2 + $0x1a0] sm:$0xff] }
 0x116   :  { %878 = vmatmul.msk.f32.vlgmr.msrb.gmra.mxu2 %vm247_vm0, %v75_v26 }
 0x117   :  { %581 = vmatpush.msrb.mxu2 %v505_v17 }
 0x119   :  { %582 = vmatpush.msrb.mxu2 %v504_v18 }
 0x11b   :  { %583 = vmatpush.msrb.mxu2 %v503_v19 }
 0x11d   :  { %584 = vmatpush.msrb.mxu2 %v502_v20 }
 0x11e   :  { %879 = vmatmul.msk.f32.gmra.mxu2 %vm247_vm0, %v78_v32 }
 0x11f   :  { %585 = vmatpush.msrb.mxu2 %v501_v21 }
 0x121   :  { %586 = vmatpush.msrb.mxu2 %v500_v23 }
 0x123   :  { %587 = vmatpush.msrb.mxu2 %v499_v24  ;;  %v782_v24 = vld [vmem:[#allocation2 + $0x240] sm:$0xff] }
 0x125   :  { %588 = vmatpush.msrb.mxu2 %v498_v25 }
 0x185   :  { %v204_v47 = vpop.f32.mrf.mxu1 }
 0x186   :  { %876 = vmatmul.msk.f32.vlgmr.msrb.gmra.mxu1 %vm247_vm0, %v204_v47  ;;  %v534_v47 = vld [vmem:[#allocation2 + $0x148] sm:$0xff] }
 0x187   :  { %552 = vmatpush.msrb.mxu1 %v536_v42 }
 0x189   :  { %v237_v48 = vpop.f32.mrf.mxu2  ;;  %553 = vmatpush.msrb.mxu1 %v535_v43 }
 0x18a   :  { %874 = vmatmul.msk.f32.vlgmr.msra.gmra.mxu3 %vm247_vm0, %v237_v48 }
 0x18b   :  { %554 = vmatpush.msrb.mxu1 %v534_v47 }
 0x18d   :  { %v207_v53 = vpop.f32.mrf.mxu1  ;;  %555 = vmatpush.msrb.mxu1 %v533_v50 }
 0x18e   :  { %877 = vmatmul.msk.f32.gmra.mxu1 %vm247_vm0, %v207_v53  ;;  %v601_v53 = vld [vmem:[#allocation2 + $0x188] sm:$0xff] }
 0x18f   :  { %556 = vmatpush.msrb.mxu1 %v532_v52 }
 0x191   :  { %v240_v54 = vpop.f32.mrf.mxu2 }
 0x192   :  { %875 = vmatmul.msk.f32.gmra.mxu3 %vm247_vm0, %v240_v54  ;;  %v531_v54 = vld [vmem:[#allocation2 + $0x130] sm:$0xff] }
 0x193   :  { %557 = vmatpush.msrb.mxu1 %v531_v54 }
 0x195   :  { %558 = vmatpush.msrb.mxu1 %v530_v56 }
 0x196   :  { %884 = vmatmul.msk.f32.vlgmr.msra.gmra.mxu1 %vm180_vm9, %v1065_v57 }
 0x199   :  { %v333_v22 = vpop.f32.mrf.mxu2 }
 0x19a   :  { %880 = vmatmul.msk.f32.vlgmr.msrb.gmra.mxu3 %vm180_vm9, %v1071_v60 }
 0x19e   :  { %885 = vmatmul.msk.f32.gmra.mxu1 %vm180_vm9, %v1079_v61 }
 0x1a1   :  { %v336_v26 = vpop.f32.mrf.mxu2 }
 0x1a2   :  { %881 = vmatmul.msk.f32.gmra.mxu3 %vm180_vm9, %v1082_v62 }
 0x203   :  { %v300_v7 = vpop.f32.mrf.mxu1 }
 0x20b   :  { %v303_v8 = vpop.f32.mrf.mxu1 }
 0x20d   :  { %v271_v9 = vpop.f32.mrf.mxu3 }
 0x20e   :  { %v301_v10 = vadd.f32 %v300_v7, %v271_v9 }
 0x210   :  { %v339_v29 = vadd.f32 %v333_v22, %v301_v10  ;;  %v727_v10 = vld [vmem:[#allocation2 + $0x218] sm:$0xff] }
 0x213   :  { %v428_v11 = vpop.f32.mrf.mxu1 }
 0x214   :  { %886 = vmatmul.msk.f32.vlgmr.msra.gmra.mxu2 %vm247_vm0, %v428_v11  ;;  %v726_v11 = vld [vmem:[#allocation2 + $0x210] sm:$0xff] }
 0x215   :  { %v274_v12 = vpop.f32.mrf.mxu3 }
 0x216   :  { %v304_v13 = vadd.f32 %v303_v8, %v274_v12  ;;  %v725_v12 = vld [vmem:[#allocation2 + $0x208] sm:$0xff] }
 0x218   :  { %v340_v31 = vadd.f32 %v336_v26, %v304_v13  ;;  %v724_v13 = vld [vmem:[#allocation2 + $0x200] sm:$0xff]  ;;  %v781_v26 = vld [vmem:[#allocation2 + $0x238] sm:$0xff] }
 0x21b   :  { %v431_v14 = vpop.f32.mrf.mxu1 }
 0x21c   :  { %887 = vmatmul.msk.f32.gmra.mxu2 %vm247_vm0, %v431_v14  ;;  %v723_v14 = vld [vmem:[#allocation2 + $0x1f8] sm:$0xff] }
 0x21d   :  { %v364_v15 = vpop.f32.mrf.mxu3 }
 0x21e   :  { %882 = vmatmul.msk.f32.vlgmr.msrb.gmra.mxu0 %vm247_vm0, %v364_v15  ;;  %v722_v15 = vld [vmem:[#allocation2 + $0x1f0] sm:$0xff] }
 0x225   :  { %v367_v16 = vpop.f32.mrf.mxu3 }
 0x226   :  { %883 = vmatmul.msk.f32.gmra.mxu0 %vm247_vm0, %v367_v16  ;;  %v721_v16 = vld [vmem:[#allocation2 + $0x1e8] sm:$0xff] }
 0x297   :  { %v461_v27 = vpop.f32.mrf.mxu2 }
 0x29b   :  { %v397_v28 = vpop.f32.mrf.mxu0 }
 0x29c   :  { %v403_v30 = vadd.f32 %v397_v28, %v339_v29  ;;  %v780_v28 = vld [vmem:[#allocation2 + $0x230] sm:$0xff] }
 0x29e   :  { %v467_v35 = vadd.f32 %v461_v27, %v403_v30  ;;  %v779_v30 = vld [vmem:[#allocation2 + $0x228] sm:$0xff] }
 0x29f   :  { %v464_v34 = vpop.f32.mrf.mxu2 }
 0x2a0   :  { %v471_v40 = vadd.f32 %v915_v36, %v467_v35 }
 0x2a2   :  { %v473_v48 = vmax.f32 %v471_v40, 0.0 }
 0x2a3   :  { %v400_v32 = vpop.f32.mrf.mxu0 }
 0x2a4   :  { %v404_v37 = vadd.f32 %v400_v32, %v340_v31 }
 0x2a6   :  { %v468_v39 = vadd.f32 %v464_v34, %v404_v37  ;;  %v916_v34 = vld [vmem:[#allocation2 + $0x220] ss:$0 sm:$0xff] }
 0x2a8   :  { %v472_v41 = vadd.f32 %v915_v36, %v468_v39 }
 0x2aa   :  { %v474_v44 = vmax.f32 %v472_v41, 0.0 }
 0x2ac   :  { %489 = vmatpush.msra.mxu3 %v474_v44  ;;  %520 = vmatpush.msra.mxu0 %v474_v44 }
 0x2ad   :  { %711 = vmatpush.msra.mxu2 %v474_v44 }
 0x2ae   :  { %490 = vmatpush.msra.mxu3 %v473_v48  ;;  %521 = vmatpush.msra.mxu0 %v473_v48 }
 0x2af   :  { %712 = vmatpush.msra.mxu2 %v473_v48  ;;  %888 = vmatmul.msk.f32.vlgmr.msra.gmra.mxu3 %vm180_vm9, %v1032_v38  ;;  %v598_v38 = vld [vmem:[#allocation2 + $0x170] sm:$0xff] }
 0x2b0   :  { %890 = vmatmul.msk.f32.vlgmr.msra.gmra.mxu0 %vm180_vm9, %v1027_v33  ;;  %618 = vmatpush.msrb.mxu3 %v603_v49  ;;  %v597_v33 = vld [vmem:[#allocation2 + $0x168] sm:$0xff] }
 0x2b1   :  { %649 = vmatpush.msrb.mxu0 %v474_v44 }
 0x2b2   :  { %619 = vmatpush.msrb.mxu3 %v602_v51 }
 0x2b3   :  { %650 = vmatpush.msrb.mxu0 %v473_v48 }
 0x2b4   :  { %620 = vmatpush.msrb.mxu3 %v601_v53 }
 0x2b5   :  { %803 = vmatpush.msra.mxu0 %v782_v24 }
 0x2b6   :  { %621 = vmatpush.msrb.mxu3 %v600_v55 }
 0x2b7   :  { %889 = vmatmul.msk.f32.gmra.mxu3 %vm180_vm9, %v1046_v46  ;;  %v529_v46 = vld [vmem:[#allocation2 + $0x120] sm:$0xff]  ;;  %804 = vmatpush.msra.mxu0 %v781_v26 }
 0x2b8   :  { %891 = vmatmul.msk.f32.gmra.mxu0 %vm180_vm9, %v1041_v45  ;;  %622 = vmatpush.msrb.mxu3 %v599_v58  ;;  %v665_v45 = vld [vmem:[#allocation2 + $0x1d8] sm:$0xff] }
 0x2b9   :  { %559 = vmatpush.msrb.mxu1 %v529_v46  ;;  %805 = vmatpush.msra.mxu0 %v780_v28 }
 0x2ba   :  { %623 = vmatpush.msrb.mxu3 %v598_v38 }
 0x2bb   :  { %680 = vmatpush.msra.mxu1 %v665_v45  ;;  %806 = vmatpush.msra.mxu0 %v779_v30 }
 0x2bc   :  { %624 = vmatpush.msrb.mxu3 %v597_v33 }
 0x2bd   :  { %681 = vmatpush.msra.mxu1 %v664_v63 }
 0x2be   :  { %625 = vmatpush.msrb.mxu3 %v596_v59 }
 0x2bf   :  { %896 = vmatmul.msk.f32.vlgmr.msrb.gmra.mxu3 %vm537_vm14, %v473_v48  ;;  %682 = vmatpush.msra.mxu1 %v663_v0  ;;  %v813_v0 = vld [vmem:[#allocation2 + $0x258] sm:$0xff] }
 0x2c0   :  { %898 = vmatmul.msk.f32.vlgmr.msrb.gmra.mxu0 %vm180_vm9, %v1071_v60  ;;  %v659_v60 = vld [vmem:[#allocation2 + $0x1a8] sm:$0xff]  ;;  %742 = vmatpush.msra.mxu3 %v727_v10 }
 0x2c1   :  { %683 = vmatpush.msra.mxu1 %v662_v1  ;;  %v812_v1 = vld [vmem:[#allocation2 + $0x250] sm:$0xff] }
 0x2c2   :  { %743 = vmatpush.msra.mxu3 %v726_v11 }
 0x2c3   :  { %684 = vmatpush.msra.mxu1 %v661_v2  ;;  %v917_v2 = vld [vmem:[#allocation2 + $0x248] ss:$0 sm:$0xff] }
 0x2c4   :  { %744 = vmatpush.msra.mxu3 %v725_v12 }
 0x2c5   :  { %685 = vmatpush.msra.mxu1 %v660_v3 }
 0x2c6   :  { %745 = vmatpush.msra.mxu3 %v724_v13 }
 0x2c7   :  { %897 = vmatmul.msk.f32.gmra.mxu3 %vm537_vm14, %v474_v44  ;;  %686 = vmatpush.msra.mxu1 %v659_v60 }
 0x2c8   :  { %899 = vmatmul.msk.f32.gmra.mxu0 %vm180_vm9, %v1082_v62  ;;  %746 = vmatpush.msra.mxu3 %v723_v14 }
 0x2c9   :  { %687 = vmatpush.msra.mxu1 %v658_v4 }
 0x2ca   :  { %747 = vmatpush.msra.mxu3 %v722_v15 }
 0x2cc   :  { %748 = vmatpush.msra.mxu3 %v721_v16 }
 0x32d   :  { %v523_v5 = vpop.f32.mrf.mxu0 }
 0x32e   :  { %892 = vmatmul.msk.f32.vlgmr.msrb.gmra.mxu1 %vm537_vm14, %v523_v5  ;;  %v918_v5 = vld [vmem:[#allocation2 + $0x260] ss:$0 sm:$0xff] }
 0x32f   :  { %833 = vmatpush.msrb.mxu1 %v813_v0 }
 0x331   :  { %834 = vmatpush.msrb.mxu1 %v812_v1 }
 0x332   :  { %v492_v62 = vpop.f32.mrf.mxu3 }
 0x333   :  { %894 = vmatmul.msk.f32.vlgmr.msrb.gmra.mxu2 %vm537_vm14, %v492_v62 }
 0x335   :  { %v526_v6 = vpop.f32.mrf.mxu0 }
 0x336   :  { %893 = vmatmul.msk.f32.gmra.mxu1 %vm537_vm14, %v526_v6 }
 0x33a   :  { %v495_v7 = vpop.f32.mrf.mxu3 }
 0x33b   :  { %895 = vmatmul.msk.f32.gmra.mxu2 %vm537_vm14, %v495_v7 }
 0x33d   :  { %v652_v8 = vpop.f32.mrf.mxu0 }
 0x33e   :  { %900 = vmatmul.msk.f32.vlgmr.msra.gmra.mxu1 %vm537_vm14, %v652_v8 }
 0x342   :  { %v627_v21 = vpop.f32.mrf.mxu3 }
 0x343   :  { %902 = vmatmul.msk.f32.vlgmr.msra.gmra.mxu2 %vm180_vm9, %v1065_v57  ;;  %v720_v57 = vld [vmem:[#allocation2 + $0x1e0] sm:$0xff] }
 0x344   :  { %749 = vmatpush.msra.mxu3 %v720_v57 }
 0x345   :  { %v655_v9 = vpop.f32.mrf.mxu0 }
 0x346   :  { %901 = vmatmul.msk.f32.gmra.mxu1 %vm537_vm14, %v655_v9 }
 0x34a   :  { %v630_v25 = vpop.f32.mrf.mxu3 }
 0x34b   :  { %903 = vmatmul.msk.f32.gmra.mxu2 %vm180_vm9, %v1079_v61 }
 0x3ab   :  { %v561_v20 = vpop.f32.mrf.mxu1 }
 0x3b3   :  { %v564_v22 = vpop.f32.mrf.mxu1 }
 0x3b6   :  { %v590_v17 = vpop.f32.mrf.mxu2 }
 0x3b7   :  { %v591_v23 = vadd.f32 %v590_v17, %v561_v20 }
 0x3b9   :  { %v633_v29 = vadd.f32 %v627_v21, %v591_v23 }
 0x3bb   :  { %v689_v27 = vpop.f32.mrf.mxu1 }
 0x3bc   :  { %v695_v31 = vadd.f32 %v689_v27, %v633_v29 }
 0x3be   :  { %v593_v18 = vpop.f32.mrf.mxu2 }
 0x3bf   :  { %v594_v32 = vadd.f32 %v593_v18, %v564_v22 }
 0x3c1   :  { %v634_v37 = vadd.f32 %v630_v25, %v594_v32 }
 0x3c3   :  { %v692_v40 = vpop.f32.mrf.mxu1 }
 0x3c4   :  { %v696_v42 = vadd.f32 %v692_v40, %v634_v37 }
 0x3c6   :  { %v714_v19 = vpop.f32.mrf.mxu2 }
 0x3c7   :  { %904 = vmatmul.msk.f32.vlgmr.msra.gmra.mxu3 %vm537_vm14, %v714_v19 }
 0x3ce   :  { %v717_v61 = vpop.f32.mrf.mxu2 }
 0x3cf   :  { %905 = vmatmul.msk.f32.gmra.mxu3 %vm537_vm14, %v717_v61 }
 0x44a   :  { %v751_v35 = vpop.f32.mrf.mxu3 }
 0x44b   :  { %v757_v36 = vadd.f32 %v751_v35, %v695_v31 }
 0x44d   :  { %v761_v39 = vadd.f32 %v916_v34, %v757_v36 }
 0x44f   :  { %v763_v41 = vmax.f32 %v761_v39, 0.0 }
 0x451   :  { %v765_v43 = vsel %vm247_vm0, %v763_v41, -inf }
 0x452   :  { %v766_v44 = vrot.slane %v765_v43, 4  ;;  %v754_v47 = vpop.f32.mrf.mxu3 }
 0x453   :  { %v758_v48 = vadd.f32 %v754_v47, %v696_v42 }
 0x454   :  { %v767_v49 = vmax.f32 %v765_v43, %v766_v44 }
 0x455   :  { %v762_v50 = vadd.f32 %v916_v34, %v758_v48 }
 0x456   :  { %v768_v52 = vrot.slane %v767_v49, 2 }
 0x457   :  { %v764_v51 = vmax.f32 %v762_v50, 0.0 }
 0x458   :  { %v769_v55 = vmax.f32 %v767_v49, %v768_v52 }
 0x459   :  { %v772_v53 = vsel %vm247_vm0, %v764_v51, -inf }
 0x45a   :  { %v773_v54 = vrot.slane %v772_v53, 4  ;;  %v770_v38 = vrot.slane %v769_v55, 1 }
 0x45c   :  { %v774_v56 = vmax.f32 %v772_v53, %v773_v54  ;;  %v771_v46 = vmax.f32 %v769_v55, %v770_v38 }
 0x45e   :  { %v775_v58 = vrot.slane %v774_v56, 2 }
 0x460   :  { %v776_v33 = vmax.f32 %v774_v56, %v775_v58 }
 0x462   :  { %v777_v59 = vrot.slane %v776_v33, 1 }
 0x464   :  { %v778_v45 = vmax.f32 %v776_v33, %v777_v59 }
 0x466   :  { %v788_v63 = vsel %vm787_vm15, %v778_v45, %v771_v46 }
 0x467   :  { %906 = vmatmul.msk.f32.vlgmr.msra.gmra.mxu0 %vm247_vm0, %v788_v63 }
 0x4e4   :  { %v808_v3 = vpop.f32.mrf.mxu0 }
 0x4e5   :  { %v809_v60 = vadd.f32 %v917_v2, %v808_v3 }
 0x4e7   :  { %v811_v4 = vmax.f32 %v809_v60, 0.0 }
 0x4e9   :  { %907 = vmatmul.msk.f32.vlgmr.msrb.gmra.mxu1 %vm180_vm9, %v811_v4 }
 0x566   :  { %v836_v62 = vpop.f32.mrf.mxu1 }
 0x567   :  { %v837_v6 = vadd.f32 %v918_v5, %v836_v62 }
 0x569   :  { %840 = vst.msk [vmem:[#allocation5] sm:$0x3] %vm839_vm1, %v837_v6 }
 0x56a   :  { %851 = dma.vmem_to_hbm [thread:$0]  %s847_s19, 32, %s849_s22, [#allocation4]  }
 0x56b   :  { %969 = dma.done.wait [#allocation4], 32  }
 0x56c   :  { %970 = vsyncadd [#allocation4], 4294967264 }
 0x56d   :  { %856 = vsyncpa [#allocation3], 1 }
 0x56e   :  { %857 = vsyncpa [#allocation4], 1 }

</bundles_post_ra>
